<compile_context>
chip_gen: v5e
topology: v5e:2x2
jax: 0.10.0
libtpu: 0.0.40
codegen_flags: <defaults>
</compile_context>

<pallas_src>
import numpy as np
import jax
import jax.numpy as jnp
from jax.experimental import pallas as pl
from jax.experimental.pallas import tpu as pltpu


# ----------------------------------------------------------------------------
# Host-side constant construction (faithful to the module __init__)
# ----------------------------------------------------------------------------
def _fbp_time_filter(H_in, filter_type="ramp"):
    """Reproduces fourier_fbp_filter + ifft/fftshift/reverse from __init__.
    Returns the reversed time filter = conv2d weights hG, shape (H,)."""
    f = np.fft.fftfreq(H_in).reshape(-1, 1)
    fourier_filter = 2.0 * np.abs(f)
    omega = 2.0 * np.pi * f
    if filter_type == "ramp":
        pass
    elif filter_type == "shepp-logan":
        fourier_filter *= np.sinc(omega / (2 * np.pi))
    elif filter_type == "cosine":
        fourier_filter *= np.cos(omega)
    elif filter_type == "hamming":
        fourier_filter *= 0.54 + 0.46 * np.cos(omega / 2)
    elif filter_type == "hann":
        fourier_filter *= (1 + np.cos(omega / 2)) / 2
    else:
        raise ValueError(f"unsupported filter type: {filter_type}")
    time_filter = np.fft.fftshift(np.fft.ifft(fourier_filter, axis=0).real)  # (H,1)
    return time_filter[::-1, 0].copy()


def _filter_matrix(H_in, filter_type="ramp"):
    """F with filtered = F @ x (detector axis) == cat([x,x,x],2) -> conv2d(hG)
       -> rows [hH+1 : hH+H+1]."""
    g = _fbp_time_filter(H_in, filter_type)
    hH = H_in // 2
    m = np.arange(H_in)[:, None]
    j = np.arange(H_in)[None, :]
    idx = (j - (hH + 1) - m) % H_in          # F[m, j] = g[(j - hH - 1 - m) mod H]
    return g[idx].astype(np.float64)          # (H, H)


def _backproj_matrix(H_in, W_in, D_out):
    """B of shape (H*W, D*D): recon_flat = filtered_flat @ B (flatten h*W + i).
       Encodes sum_i grid_sample(filtered, tG[i], bilinear, zeros,
       align_corners=True)."""
    theta = np.linspace(0.0, 180.0, W_in, endpoint=False)
    th = np.pi / 180.0 * theta
    X, Y = np.mgrid[0:D_out, 0:D_out]
    xpr = X - D_out // 2
    ypr = Y - D_out // 2
    hH = H_in // 2
    B = np.zeros((H_in * W_in, D_out * D_out), dtype=np.float64)
    p = np.arange(D_out * D_out)
    for i in range(W_in):
        t = ypr * np.cos(th[i]) - xpr * np.sin(th[i])   # (D, D)
        iy = (t / hH + 1.0) / 2.0 * (H_in - 1)          # align_corners=True
        y0 = np.floor(iy).astype(np.int64)
        wy = (iy - y0).reshape(-1)
        y0 = y0.reshape(-1)
        y1 = y0 + 1
        v0 = (y0 >= 0) & (y0 <= H_in - 1)
        v1 = (y1 >= 0) & (y1 <= H_in - 1)
        np.add.at(B, (y0[v0] * W_in + i, p[v0]), (1.0 - wy)[v0])
        np.add.at(B, (y1[v1] * W_in + i, p[v1]), wy[v1])
    return B


def _fused_fbp_matrix(H_in, W_in, D_out, filter_type="ramp"):
    """B' such that recon_flat = raw_sino_flat @ B' (raw flatten index k*W + w):
         B'[k*W + w, p] = (pi / (2*W)) * sum_h F[h, k] * B[h*W + w, p]."""
    F = _filter_matrix(H_in, filter_type)                 # (H, H)
    B = _backproj_matrix(H_in, W_in, D_out)               # (H*W, D*D)
    scale = np.pi / (2.0 * W_in)
    B3 = B.reshape(H_in, W_in, D_out * D_out)
    Bp = np.einsum("hk,hwp->kwp", F, B3) * scale          # (H, W, D*D)
    return Bp.reshape(H_in * W_in, D_out * D_out)


def _round_up(x, m):
    return ((x + m - 1) // m) * m


def _pick_tile(dim, pref):
    """Largest multiple of 128 that divides `dim` and is <= pref (dim is
    already padded to a multiple of 128)."""
    t = max(128, (min(pref, dim) // 128) * 128)
    while t > 128:
        if dim % t == 0:
            return t
        t -= 128
    return 128 if dim % 128 == 0 else dim


# ----------------------------------------------------------------------------
# Pallas kernel: fused filtered back-projection as one tiled matmul
#   recon_flat (Npad, Ppad) f32 = sino_flat (Npad, Kpad) bf16 @ B' (Kpad, Ppad) bf16
# ----------------------------------------------------------------------------
def _fused_fbp_pallas(x_flat, Bp):
    Npad, Kpad = x_flat.shape
    Kb, Ppad = Bp.shape
    assert Kpad == Kb

    tk = _pick_tile(Kpad, 1024)
    # cap tn at P/2 so gp >= 2 and the 'parallel' axis feeds both v7x cores
    tn = _pick_tile(Ppad, min(2048, max(128, Ppad // 2)))
    gk = Kpad // tk
    gp = Ppad // tn

    # Tiny sinogram slab stays fully resident (fetched once, constant block
    # index); fall back to k-tiled streaming only if it would not fit cheaply.
    x_resident = (Npad * Kpad * 2) <= (4 << 20)
    if x_resident:
        x_spec = pl.BlockSpec((Npad, Kpad), lambda j, k: (0, 0))
    else:
        x_spec = pl.BlockSpec((Npad, tk), lambda j, k: (0, k))

    def kernel(x_ref, b_ref, o_ref):
        k = pl.program_id(1)

        @pl.when(k == 0)
        def _init():
            o_ref[...] = jnp.zeros_like(o_ref)

        if x_resident:
            start = pl.multiple_of(k * tk, tk)
            xk = x_ref[:, pl.ds(start, tk)]
        else:
            xk = x_ref[...]

        # native bf16 x bf16 MXU path, f32 accumulation directly in the
        # (resident, f32) output block -- no scratch accumulator / finalize copy
        o_ref[...] += jnp.dot(xk, b_ref[...], preferred_element_type=jnp.float32)

    return pl.pallas_call(
        kernel,
        out_shape=jax.ShapeDtypeStruct((Npad, Ppad), jnp.float32),
        grid_spec=pltpu.PrefetchScalarGridSpec(
            num_scalar_prefetch=0,
            grid=(gp, gk),                                    # K (reduction) last
            in_specs=[
                x_spec,                                        # sinogram slab
                pl.BlockSpec((tk, tn), lambda j, k: (k, j)),   # fused B' tile
            ],
            out_specs=pl.BlockSpec((Npad, tn), lambda j, k: (0, j)),
        ),
        compiler_params=pltpu.CompilerParams(
            dimension_semantics=("parallel", "arbitrary"),
            vmem_limit_bytes=48 * 1024 * 1024,   # < v7x 64 MiB; > v5e/v6e scoped defaults
        ),
    )(x_flat, Bp)


# ----------------------------------------------------------------------------
# Module wrapper
# ----------------------------------------------------------------------------
class InvRadonLayerPallas:
    def __init__(self, H_in, W_in, D_out, filter_type="ramp"):
        self.H_in, self.W_in, self.D_out = H_in, W_in, D_out
        self.K = H_in * W_in
        self.P = D_out * D_out
        self.Kpad = _round_up(self.K, 128)
        self.Ppad = _round_up(self.P, 128)
        # Single fused constant: filter circulant, back-projection weights and
        # the pi/(2W) scale folded host-side (f64), zero-padded to aligned
        # shapes, stored bf16 (kernel is HBM-bound on streaming B').
        Bp = _fused_fbp_matrix(H_in, W_in, D_out, filter_type)
        Bp_pad = np.zeros((self.Kpad, self.Ppad), dtype=np.float32)
        Bp_pad[: self.K, : self.P] = Bp.astype(np.float32)
        self.Bp = jnp.asarray(Bp_pad).astype(jnp.bfloat16)

    def __call__(self, radon_image):
        # radon_image: (N, 1, H_in, W_in) float32, NCHW as in PyTorch
        N = radon_image.shape[0]
        x_flat = radon_image.reshape(N, self.K).astype(jnp.bfloat16)
        if self.Kpad > self.K:
            x_flat = jnp.pad(x_flat, ((0, 0), (0, self.Kpad - self.K)))
        Npad = _round_up(max(N, 8), 8)          # sublane-align the batch
        if Npad > N:
            x_flat = jnp.pad(x_flat, ((0, Npad - N), (0, 0)))
        recon = _fused_fbp_pallas(x_flat, self.Bp)          # (Npad, Ppad) f32
        recon = recon[:N, : self.P]
        return recon.reshape(N, 1, self.D_out, self.D_out)


# ----------------------------------------------------------------------------
# Direct (matrix-free) NumPy reference of the original two-stage torch math:
# circular conv filter, then per-angle bilinear back-projection, then scale.
# ----------------------------------------------------------------------------
def _reference_fbp(x_np, H, W, D, filter_type="ramp"):
    g_rev = _fbp_time_filter(H, filter_type)        # conv2d weights hG, (H,)
    hH = H // 2
    N = x_np.shape[0]
    x3 = x_np[:, 0, :, :].astype(np.float64)        # (N, H, W)
    padded = np.concatenate([x3, x3, x3], axis=1)   # (N, 3H, W)
    filt = np.zeros((N, H, W))
    for r in range(H):                              # cross-correlation + crop
        filt[:, r, :] = np.einsum("k,nkw->nw", g_rev,
                                  padded[:, hH + 1 + r: hH + 1 + r + H, :])
    theta = np.linspace(0.0, 180.0, W, endpoint=False)
    th = np.pi / 180.0 * theta
    X, Y = np.mgrid[0:D, 0:D]
    xpr = X - D // 2
    ypr = Y - D // 2
    recon = np.zeros((N, D, D))
    for i in range(W):
        t = ypr * np.cos(th[i]) - xpr * np.sin(th[i])
        iy = (t / hH + 1.0) / 2.0 * (H - 1)         # align_corners=True
        y0 = np.floor(iy).astype(np.int64)
        wy = iy - y0
        y1 = y0 + 1
        col = filt[:, :, i]                         # (N, H)

        def gather(idx):
            valid = (idx >= 0) & (idx <= H - 1)
            vals = col[:, np.clip(idx, 0, H - 1).reshape(-1)].reshape(N, D, D)
            return vals * valid[None, :, :]

        recon += gather(y0) * (1.0 - wy)[None] + gather(y1) * wy[None]
    return (recon * np.pi / (2.0 * W)).reshape(N, 1, D, D)


# ----------------------------------------------------------------------------
if __name__ == "__main__":
    H_in, W_in, D_out, N = 32, 16, 32, 2
    key = jax.random.PRNGKey(0)
    radon_image = jax.random.normal(key, (N, 1, H_in, W_in), dtype=jnp.float32)

    layer = InvRadonLayerPallas(H_in, W_in, D_out, filter_type="ramp")
    out = jax.block_until_ready(layer(radon_image))

    ref = _reference_fbp(np.asarray(radon_image), H_in, W_in, D_out, "ramp")

    np.testing.assert_allclose(np.asarray(out), ref, rtol=5e-2, atol=2e-2)
    assert out.shape == (N, 1, D_out, D_out)
    assert np.isfinite(np.asarray(out)).all()
    print("KERNEL_OK")
</pallas_src>

<mosaic_0001>
module attributes {stable_mosaic.version = 11 : i64} {
  func.func @kernel(%arg0: i32, %arg1: i32, %arg2: memref<8x512xbf16, #tpu.memory_space<vmem>>, %arg3: memref<512x512xbf16, #tpu.memory_space<vmem>>, %arg4: memref<8x512xf32, #tpu.memory_space<vmem>>) attributes {dimension_semantics = [#tpu.dimension_semantics<parallel>, #tpu.dimension_semantics<arbitrary>], iteration_bounds = array<i64: 2, 1>, scalar_prefetch = 0 : i64, scratch_operands = 0 : i64, tpu.core_type = #tpu.core_type<tc>, window_params = [{pipeline_mode = #tpu.pipeline_mode<synchronous>, transform_indices = @transform_0, window_bounds = array<i64: 8, 512>}, {transform_indices = @transform_1, window_bounds = array<i64: 512, 512>}, {transform_indices = @transform_2, window_bounds = array<i64: 8, 512>}]} {
    %c0_i32 = arith.constant 0 : i32
    %0 = arith.cmpi eq, %arg1, %c0_i32 : i32
    %1 = arith.extui %0 : i1 to i32
    %c0_i32_0 = arith.constant 0 : i32
    %2 = arith.cmpi ne, %1, %c0_i32_0 : i32
    scf.if %2 {
      %cst_7 = arith.constant 0.000000e+00 : f32
      %12 = vector.broadcast %cst_7 : f32 to vector<8x512xf32>
      %c0_8 = arith.constant 0 : index
      %c0_9 = arith.constant 0 : index
      %13 = vector.load %arg4[%c0_8, %c0_9] : memref<8x512xf32, #tpu.memory_space<vmem>>, vector<8x512xf32>
      tpu.vector_store %arg4[%c0_8, %c0_9], %12 {strides = array<i32>} : memref<8x512xf32, #tpu.memory_space<vmem>>, vector<8x512xf32>,
    } else {
    }
    %c512_i32 = arith.constant 512 : i32
    %3 = arith.muli %arg1, %c512_i32 : i32
    %4 = tpu.assume_multiple %3, 512 : i32
    %c0 = arith.constant 0 : index
    %5 = arith.index_cast %4 : i32 to index
    %6 = vector.load %arg2[%c0, %5] : memref<8x512xbf16, #tpu.memory_space<vmem>>, vector<8x512xbf16>
    %c0_1 = arith.constant 0 : index
    %c0_2 = arith.constant 0 : index
    %7 = vector.load %arg4[%c0_1, %c0_2] : memref<8x512xf32, #tpu.memory_space<vmem>>, vector<8x512xf32>
    %c0_3 = arith.constant 0 : index
    %c0_4 = arith.constant 0 : index
    %8 = vector.load %arg3[%c0_3, %c0_4] : memref<512x512xbf16, #tpu.memory_space<vmem>>, vector<512x512xbf16>
    %cst = arith.constant dense<0.000000e+00> : vector<8x512xf32>
    %9 = tpu.matmul %6, %8, %cst {dimension_numbers = #tpu.dot_dimension_numbers<[1], [0], [0], [1], [0, 0, 1, 1], [], []>} : vector<8x512xbf16>, vector<512x512xbf16>, vector<8x512xf32> -> vector<8x512xf32>
    %10 = arith.addf %7, %9 : vector<8x512xf32>
    %c0_5 = arith.constant 0 : index
    %c0_6 = arith.constant 0 : index
    %11 = vector.load %arg4[%c0_5, %c0_6] : memref<8x512xf32, #tpu.memory_space<vmem>>, vector<8x512xf32>
    tpu.vector_store %arg4[%c0_5, %c0_6], %10 {strides = array<i32>} : memref<8x512xf32, #tpu.memory_space<vmem>>, vector<8x512xf32>,
    return
  }
  func.func @transform_0(%arg0: i32, %arg1: i32) -> (i32, i32) {
    %c0_i32 = arith.constant 0 : i32
    %c0_i32_0 = arith.constant 0 : i32
    %c0_i32_1 = arith.constant 0 : i32
    return %c0_i32, %c0_i32_0 : i32, i32
  }
  func.func @transform_1(%arg0: i32, %arg1: i32) -> (i32, i32) {
    %c0_i32 = arith.constant 0 : i32
    return %arg1, %arg0 : i32, i32
  }
  func.func @transform_2(%arg0: i32, %arg1: i32) -> (i32, i32) {
    %c0_i32 = arith.constant 0 : i32
    %c0_i32_0 = arith.constant 0 : i32
    return %c0_i32, %arg0 : i32, i32
  }
}

</mosaic_0001>

<bundles_post_ra>
// kernel: tpu_custom_call.1
= control target key start
LH: loop header
LB: loop body
LE: loop exit
PB: predicated region body
PF: predicated region fallthrough
CT: control target
= control target key end

     0   :  { %s2672_s0 = inlined_call_operand.hbm [shape: bf16[8,512], index: 0, kind: input, shape index: {}]   ;;  %s2673_s1 = inlined_call_operand.hbm [shape: bf16[512,1024], index: 1, kind: input, shape index: {}]   ;;  %s2674_s2 = inlined_call_operand.hbm [shape: f32[8,1024], index: 2, kind: output, shape index: {}]  }
   0x1   :  { %2675 = sst [smem:[#allocation11_spill]] %s2672_s0 }
   0x2   :  { %7 = vsyncpa [#allocation3], 0 }
   0x3   :  { %8 = vsyncpa [#allocation6], 0 }
   0x4   :  { %10 = vsyncpa [#allocation6 + $0x1], 0 }
   0x5   :  { %11 = vsyncpa [#allocation4], 0 }
   0x6   :  { %13 = vsyncpa [#allocation4 + $0x1], 0  ;;  %s2231_s9 = smov 0   ;;  %s2233_s10 = smov 0  }
   0x7   :  { %s2235_s11 = smov 0   ;;  %s2237_s12 = smov 0  }
   0x8   :  { %s2239_s13 = smov 0   ;;  %s2241_s14 = smov 0  }
   0x9 LB: > { %s1328_s15 = sadd.s32 4294967295, %s2210_s14   ;;  %s1329_s16 = sadd.s32 4294967294, %s2210_s14   ;;  %s2210_s14 = sphi %s2241_s14, %s19_s14   ;;  %s2206_s13 = sphi %s2239_s13, %s2688_s13   ;;  %s2202_s12 = sphi %s2237_s12, %s2687_s12   ;;  %s2198_s11 = sphi %s2235_s11, %s2686_s11   ;;  %s2194_s10 = sphi %s2233_s10, %s2685_s10   ;;  %s2190_s9 = sphi %s2231_s9, %s2684_s9  }
   0xa   : > { %s61_s17 = sadd.s32 1, %s2198_s11  ;;  %p68_p0 = scmp.ne.s32.totalorder %s2198_s11, %s2194_s10 }
   0xb   : > { %p69_p1 = scmp.eq.s32.totalorder %s2210_s14, 0  ;;  %p74_p2 = scmp.ne.s32.totalorder %s2194_s10, %s2190_s9 }
   0xc   : > { %p2269_p3 = scmp.eq.s32.totalorder %s1328_s15, 0  ;;  %p98_p4 = scmp.eq.s32.totalorder %s1328_s15, 1 }
   0xd   : > { %p2273_p5 = por %p69_p1, %p68_p0  ;;  %p104_p6 = scmp.eq.s32.totalorder %s1329_s16, 1 }
   0xe   : > { %p2279_p7 = por %p2269_p3, %p74_p2  ;;  %p2283_p8 = por %p98_p4, %p68_p0 }
   0xf   : > { %p2287_p9 = por %p104_p6, %p74_p2  ;;  %p1330_p10 = scmp.ge.s32.totalorder %s2210_s14, 1 }
  0x10   : > { %p111_p11 = scmp.lt.s32.totalorder %s2210_s14, 3  ;;  %s2681_s0 = sld [smem:[#allocation11_spill]] }
  0x11   : > { %s2212_s27 = smov [#allocation2]   ;;  %p1332_p13 = scmp.ge.s32.totalorder %s2210_s14, 2 }
  0x12   : > { %p2296_p12 = pnand %p1330_p10, %p111_p11  ;;  %s125_s28 = sshll.u32 %s2212_s27, 4  ;;  %s126_s28 = int_to_ptr.vmem [resolvable:$true] %s125_s28 }
  0x13   : > { %p2008_p1 = scmp.lt.s32.totalorder %s2210_s14, 2  ;;  %s31_s30 = sadd.s32 1, %s2206_s13 }
  0x14   : > { %p1995_p0 = pneg %p2296_p12  ;;  %p33_p6 = scmp.ge.s32.totalorder %s31_s30, 2 }
  0x15   : > { %p2308_p4 = pnand %p2008_p1, %p2273_p5  ;;  %s136_s3 = sand.u32 1, %s2198_s11  }
  0x16   : > { %s123_s25 = sshll.u32 %s2681_s0, 4  ;;  %p1996_p2 = pnand %p1995_p0, %p2269_p3  ;;  %s124_s25 = int_to_ptr.hbm [resolvable:$true] %s123_s25 }
  0x17   : > { %s2690_s30 = smov (%p33_p6, %s31_s30), 0  ;;  %s1333_s4 = sshll.u32 %s136_s3, 10 }
  0x18   : > { %1998 = dma.hbm_to_vmem [thread:$0]  (!%p1996_p2), %s124_s25, 256, %s126_s28, [#allocation3]  }
  0x19   : > { %s57_s5 = ssub.s32 %s2206_s13, %s2690_s30  ;;  %s1857_s6 = sshll.u32 %s2206_s13, 4 }
  0x1a   : > { %p59_p10 = scmp.eq.s32.totalorder %s57_s5, 0  ;;  %s148_s15 = scalar_lea.hbm %s2673_s1, %s1857_s6 }
  0x1b   : > { %s140_s16 = scalar_lea.vmem [#allocation5], %s1333_s4  ;;  %s149_s24 = sshll.u32 %s148_s15, 4  ;;  %s150_s24 = int_to_ptr.hbm [resolvable:$true] %s149_s24 }
  0x1c   : > { %s151_s19 = sshll.u32 %s140_s16, 4  ;;  %s137_s25 = scalar_lea.sflag [#allocation6], %s136_s3  ;;  %s152_s19 = int_to_ptr.vmem [resolvable:$true] %s151_s19 }
  0x1d   : > { %s2325_s23 = scalar_select %p59_p10, %s2198_s11, %s61_s17  }
  0x1e   : > { %s2213_s27 = smov 512   ;;  %s2214_s28 = smov 256  }
  0x1f   : > { %s2215_s0 = smov 16   ;;  %163 = sbr.rel (%p2296_p12) target bundleno = 315 (0x13b), region = 28 }
  0x20   : > { %2002 = dma.hbm_to_vmem [thread:$0]  (!%p2308_p4), %s150_s24, 16384, %s152_s19, %s137_s25, %s2213_s27, %s2214_s28, %s2215_s0  }
  0x24   : > { %2177 = dma.done.wait (%p2269_p3), [#allocation3], 256  }
  0x25   : > { %2179 = vsyncadd (%p2269_p3), [#allocation3], 4294967040  ;;  %s2336_s17 = sand.u32 1, %s2194_s10  }
  0x26   : > { %s1338_s3 = sshll.u32 %s2336_s17, 10  ;;  %s171_s4 = scalar_lea.sflag [#allocation6], %s2336_s17 }
  0x27   : > { %s2340_s5 = scalar_lea.vmem [#allocation5], %s1338_s3 }
  0x28   : > { %2181 = dma.done.wait (%p2279_p7), %s171_s4, 16384  }
  0x29   : > { %2183 = vsyncadd (%p2279_p7), %s171_s4, 4294950912  ;;  %v1454_v0 = vld [vmem:[%s2340_s5 + $0xe0] sm:$0xf]  ;;  %v1888_v1 = vld [vmem:[%s2340_s5 + $0xec] sm:$0xf0]  ;;  %s1339_s0 = sshll.u32 %s2336_s17, 5 }
  0x2a   : > { %v1582_v2 = vld [vmem:[%s2340_s5 + $0x1e0] sm:$0xf]  ;;  %v1455_v3 = vor.u32 %v1888_v1, %v1454_v0  ;;  %v1920_v4 = vld [vmem:[%s2340_s5 + $0x1ec] sm:$0xf0]  ;;  %s2627_s18 = scalar_lea.vmem [#allocation7], %s1339_s0  ;;  %s1986_s20 = sshll.u32 %s2202_s12, 5 }
  0x2b   : > { %v1710_v5 = vld [vmem:[%s2340_s5 + $0x2e0] sm:$0xf]  ;;  %v1952_v6 = vld [vmem:[%s2340_s5 + $0x2ec] sm:$0xf0]  ;;  %v1583_v7 = vor.u32 %v1920_v4, %v1582_v2  ;;  %s1228_s6 = scalar_lea.hbm %s2674_s2, %s1986_s20  ;;  %s1230_s7 = sshll.u32 %s2627_s18, 4  ;;  %s1231_s7 = int_to_ptr.vmem [resolvable:$true] %s1230_s7 }
  0x2c   : > { %v1711_v8 = vor.u32 %v1952_v6, %v1710_v5  ;;  %v1838_v9 = vld [vmem:[%s2340_s5 + $0x3e0] sm:$0xf]  ;;  %v1984_v10 = vld [vmem:[%s2340_s5 + $0x3ec] sm:$0xf0]  ;;  %1000 = vmatpush.bf16.msra.mxu0 %v1455_v3  ;;  %s1232_s8 = sshll.u32 %s1228_s6, 4  ;;  %s1217_s15 = scalar_lea.sflag [#allocation4], %s2336_s17  ;;  %s1233_s8 = int_to_ptr.hbm [resolvable:$true] %s1232_s8 }
  0x2d   : > { %v1438_v11 = vld [vmem:[%s2340_s5 + $0xc0] sm:$0xf]  ;;  %v1839_v12 = vor.u32 %v1984_v10, %v1838_v9  ;;  %v1884_v13 = vld [vmem:[%s2340_s5 + $0xcc] sm:$0xf0]  ;;  %1013 = vmatpush.bf16.msra.mxu1 %v1583_v7  ;;  %s2138_s12 = sshra.s32 %s1233_s8, 4  ;;  %s2144_s25 = scalar_lea.hbm %s2674_s2, 64  ;;  %s2139_s12 = int_to_ptr.hbm [resolvable:$true] %s2138_s12 }
  0x2e   : > { %v1566_v14 = vld [vmem:[%s2340_s5 + $0x1c0] sm:$0xf]  ;;  %v1916_v15 = vld [vmem:[%s2340_s5 + $0x1cc] sm:$0xf0]  ;;  %1026 = vmatpush.bf16.msra.mxu2 %v1711_v8  ;;  %v1439_v16 = vor.u32 %v1884_v13, %v1438_v11  ;;  %s2140_s16 = scalar_lea.hbm %s2139_s12, 32  ;;  %p2145_p11 = scmp.lt.s32.totalorder %s2139_s12, %s2674_s2 }
  0x2f   : > { %v1567_v17 = vor.u32 %v1916_v15, %v1566_v14  ;;  %v1694_v18 = vld [vmem:[%s2340_s5 + $0x2c0] sm:$0xf]  ;;  %v1948_v19 = vld [vmem:[%s2340_s5 + $0x2cc] sm:$0xf0]  ;;  %1039 = vmatpush.bf16.msra.mxu3 %v1839_v12  ;;  %p2141_p3 = scmp.ne.s32.totalorder %s2139_s12, %s2140_s16  ;;  %p2146_p12 = scmp.lt.s32.totalorder %s2144_s25, %s2140_s16 }
  0x30   : > { %v1822_v20 = vld [vmem:[%s2340_s5 + $0x3c0] sm:$0xf]  ;;  %v1695_v21 = vor.u32 %v1948_v19, %v1694_v18  ;;  %v1980_v22 = vld [vmem:[%s2340_s5 + $0x3cc] sm:$0xf0]  ;;  %1001 = vmatpush.bf16.msra.mxu0 %v1439_v16 }
  0x31   : > { %v1422_v23 = vld [vmem:[%s2340_s5 + $0xa0] sm:$0xf]  ;;  %v1880_v24 = vld [vmem:[%s2340_s5 + $0xac] sm:$0xf0]  ;;  %v1823_v25 = vor.u32 %v1980_v22, %v1822_v20  ;;  %1014 = vmatpush.bf16.msra.mxu1 %v1567_v17  ;;  %p2142_p5 = pnand %p2141_p3, %p2283_p8  ;;  %p2147_p0 = por %p2146_p12, %p2145_p11 }
  0x32   : > { %v1550_v26 = vld [vmem:[%s2340_s5 + $0x1a0] sm:$0xf]  ;;  %v1912_v27 = vld [vmem:[%s2340_s5 + $0x1ac] sm:$0xf0]  ;;  %v1423_v29 = vor.u32 %v1880_v24, %v1422_v23  ;;  %1027 = vmatpush.bf16.msra.mxu2 %v1695_v21 }
  0x33   : > { %v1678_v28 = vld [vmem:[%s2340_s5 + $0x2a0] sm:$0xf]  ;;  %v1944_v30 = vld [vmem:[%s2340_s5 + $0x2ac] sm:$0xf0]  ;;  %v1551_v33 = vor.u32 %v1912_v27, %v1550_v26  ;;  %1040 = vmatpush.bf16.msra.mxu3 %v1823_v25  ;;  %p2143_p7 = pneg %p2142_p5 }
  0x34   : > { %v1806_v31 = vld [vmem:[%s2340_s5 + $0x3a0] sm:$0xf]  ;;  %v1976_v32 = vld [vmem:[%s2340_s5 + $0x3ac] sm:$0xf0]  ;;  %v1679_v34 = vor.u32 %v1944_v30, %v1678_v28  ;;  %1002 = vmatpush.bf16.msra.mxu0 %v1423_v29  ;;  %v1886_v28 = vld [vmem:[%s2340_s5 + $0xe4] sm:$0xf] }
  0x35   : > { %v1406_v35 = vld [vmem:[%s2340_s5 + $0x80] sm:$0xf]  ;;  %v1876_v36 = vld [vmem:[%s2340_s5 + $0x8c] sm:$0xf0]  ;;  %v1807_v38 = vor.u32 %v1976_v32, %v1806_v31  ;;  %1015 = vmatpush.bf16.msra.mxu1 %v1551_v33  ;;  %v1456_v29 = vld [vmem:[%s2340_s5 + $0xf0] sm:$0xf0]  ;;  %p2148_p1 = pnand %p2147_p0, %p2143_p7 }
  0x36   : > { %v1534_v37 = vld [vmem:[%s2340_s5 + $0x180] sm:$0xf]  ;;  %v1908_v39 = vld [vmem:[%s2340_s5 + $0x18c] sm:$0xf0]  ;;  %v1407_v44 = vor.u32 %v1876_v36, %v1406_v35  ;;  %1028 = vmatpush.bf16.msra.mxu2 %v1679_v34  ;;  %v1918_v30 = vld [vmem:[%s2340_s5 + $0x1e4] sm:$0xf] }
  0x37   : > { %v1662_v40 = vld [vmem:[%s2340_s5 + $0x280] sm:$0xf]  ;;  %v1940_v41 = vld [vmem:[%s2340_s5 + $0x28c] sm:$0xf0]  ;;  %v1535_v45 = vor.u32 %v1908_v39, %v1534_v37  ;;  %1041 = vmatpush.bf16.msra.mxu3 %v1807_v38  ;;  %v1584_v32 = vld [vmem:[%s2340_s5 + $0x1f0] sm:$0xf0] }
  0x38   : > { %v1790_v42 = vld [vmem:[%s2340_s5 + $0x380] sm:$0xf]  ;;  %v1972_v43 = vld [vmem:[%s2340_s5 + $0x38c] sm:$0xf0]  ;;  %v1663_v46 = vor.u32 %v1940_v41, %v1662_v40  ;;  %1003 = vmatpush.bf16.msra.mxu0 %v1407_v44  ;;  %v1950_v33 = vld [vmem:[%s2340_s5 + $0x2e4] sm:$0xf]  ;;  %v1459_v40 = vor.u32 %v1886_v28, %v1456_v29  ;;  %v1587_v41 = vor.u32 %v1918_v30, %v1584_v32 }
  0x39   : > { %v1390_v47 = vld [vmem:[%s2340_s5 + $0x60] sm:$0xf]  ;;  %v1872_v48 = vld [vmem:[%s2340_s5 + $0x6c] sm:$0xf0]  ;;  %v1791_v50 = vor.u32 %v1972_v43, %v1790_v42  ;;  %1016 = vmatpush.bf16.msra.mxu1 %v1535_v45  ;;  %v1712_v34 = vld [vmem:[%s2340_s5 + $0x2f0] sm:$0xf0] }
  0x3a   : > { %v1518_v49 = vld [vmem:[%s2340_s5 + $0x160] sm:$0xf]  ;;  %v1904_v51 = vld [vmem:[%s2340_s5 + $0x16c] sm:$0xf0]  ;;  %v1391_v56 = vor.u32 %v1872_v48, %v1390_v47  ;;  %1029 = vmatpush.bf16.msra.mxu2 %v1663_v46  ;;  %v1982_v37 = vld [vmem:[%s2340_s5 + $0x3e4] sm:$0xf]  ;;  %v1715_v42 = vor.u32 %v1950_v33, %v1712_v34 }
  0x3b   : > { %v1646_v52 = vld [vmem:[%s2340_s5 + $0x260] sm:$0xf]  ;;  %v1936_v53 = vld [vmem:[%s2340_s5 + $0x26c] sm:$0xf0]  ;;  %v1519_v57 = vor.u32 %v1904_v51, %v1518_v49  ;;  %1042 = vmatpush.bf16.msra.mxu3 %v1791_v50  ;;  %v1840_v38 = vld [vmem:[%s2340_s5 + $0x3f0] sm:$0xf0] }
  0x3c   : > { %v1774_v54 = vld [vmem:[%s2340_s5 + $0x360] sm:$0xf]  ;;  %v1968_v55 = vld [vmem:[%s2340_s5 + $0x36c] sm:$0xf0]  ;;  %v1647_v58 = vor.u32 %v1936_v53, %v1646_v52  ;;  %1004 = vmatpush.bf16.msra.mxu0 %v1391_v56  ;;  %v1882_v43 = vld [vmem:[%s2340_s5 + $0xc4] sm:$0xf]  ;;  %v1843_v46 = vor.u32 %v1982_v37, %v1840_v38 }
  0x3d   : > { %v1374_v59 = vld [vmem:[%s2340_s5 + $0x40] sm:$0xf]  ;;  %v1868_v60 = vld [vmem:[%s2340_s5 + $0x4c] sm:$0xf0]  ;;  %v1775_v62 = vor.u32 %v1968_v55, %v1774_v54  ;;  %1017 = vmatpush.bf16.msra.mxu1 %v1519_v57  ;;  %v1440_v44 = vld [vmem:[%s2340_s5 + $0xd0] sm:$0xf0] }
  0x3e   : > { %v1502_v61 = vld [vmem:[%s2340_s5 + $0x140] sm:$0xf]  ;;  %v1900_v63 = vld [vmem:[%s2340_s5 + $0x14c] sm:$0xf0]  ;;  %v1375_v4 = vor.u32 %v1868_v60, %v1374_v59  ;;  %1030 = vmatpush.bf16.msra.mxu2 %v1647_v58  ;;  %v1914_v45 = vld [vmem:[%s2340_s5 + $0x1c4] sm:$0xf]  ;;  %v1443_v52 = vor.u32 %v1882_v43, %v1440_v44 }
  0x3f   : > { %v1630_v0 = vld [vmem:[%s2340_s5 + $0x240] sm:$0xf]  ;;  %v1932_v1 = vld [vmem:[%s2340_s5 + $0x24c] sm:$0xf0]  ;;  %v1503_v5 = vor.u32 %v1900_v63, %v1502_v61  ;;  %1043 = vmatpush.bf16.msra.mxu3 %v1775_v62  ;;  %v1568_v47 = vld [vmem:[%s2340_s5 + $0x1d0] sm:$0xf0] }
  0x40   : > { %v1758_v2 = vld [vmem:[%s2340_s5 + $0x340] sm:$0xf]  ;;  %v1964_v3 = vld [vmem:[%s2340_s5 + $0x34c] sm:$0xf0]  ;;  %v1631_v6 = vor.u32 %v1932_v1, %v1630_v0  ;;  %1005 = vmatpush.bf16.msra.mxu0 %v1375_v4  ;;  %v1946_v48 = vld [vmem:[%s2340_s5 + $0x2c4] sm:$0xf]  ;;  %v1571_v53 = vor.u32 %v1914_v45, %v1568_v47 }
  0x41   : > { %v1358_v7 = vld [vmem:[%s2340_s5 + $0x20] sm:$0xf]  ;;  %v1864_v8 = vld [vmem:[%s2340_s5 + $0x2c] sm:$0xf0]  ;;  %v1759_v10 = vor.u32 %v1964_v3, %v1758_v2  ;;  %1018 = vmatpush.bf16.msra.mxu1 %v1503_v5  ;;  %v1696_v49 = vld [vmem:[%s2340_s5 + $0x2d0] sm:$0xf0] }
  0x42   : > { %v1486_v9 = vld [vmem:[%s2340_s5 + $0x120] sm:$0xf]  ;;  %v1896_v11 = vld [vmem:[%s2340_s5 + $0x12c] sm:$0xf0]  ;;  %v1359_v16 = vor.u32 %v1864_v8, %v1358_v7  ;;  %1031 = vmatpush.bf16.msra.mxu2 %v1631_v6  ;;  %v1978_v50 = vld [vmem:[%s2340_s5 + $0x3c4] sm:$0xf]  ;;  %v1699_v54 = vor.u32 %v1946_v48, %v1696_v49 }
  0x43   : > { %v1614_v12 = vld [vmem:[%s2340_s5 + $0x220] sm:$0xf]  ;;  %v1928_v13 = vld [vmem:[%s2340_s5 + $0x22c] sm:$0xf0]  ;;  %v1487_v19 = vor.u32 %v1896_v11, %v1486_v9  ;;  %1044 = vmatpush.bf16.msra.mxu3 %v1759_v10  ;;  %v1824_v51 = vld [vmem:[%s2340_s5 + $0x3d0] sm:$0xf0] }
  0x44   : > { %v1742_v14 = vld [vmem:[%s2340_s5 + $0x320] sm:$0xf]  ;;  %v1960_v15 = vld [vmem:[%s2340_s5 + $0x32c] sm:$0xf0]  ;;  %v1615_v20 = vor.u32 %v1928_v13, %v1614_v12  ;;  %1006 = vmatpush.bf16.msra.mxu0 %v1359_v16  ;;  %v1878_v55 = vld [vmem:[%s2340_s5 + $0xa4] sm:$0xf]  ;;  %v1827_v58 = vor.u32 %v1978_v50, %v1824_v51 }
  0x45   : > { %v1342_v17 = vld [vmem:[%s2340_s5] sm:$0xf]  ;;  %v1860_v18 = vld [vmem:[%s2340_s5 + $0xc] sm:$0xf0]  ;;  %v1743_v24 = vor.u32 %v1960_v15, %v1742_v14  ;;  %1019 = vmatpush.bf16.msra.mxu1 %v1487_v19  ;;  %v1424_v56 = vld [vmem:[%s2340_s5 + $0xb0] sm:$0xf0] }
  0x46   : > { %v1470_v21 = vld [vmem:[%s2340_s5 + $0x100] sm:$0xf]  ;;  %v1892_v22 = vld [vmem:[%s2340_s5 + $0x10c] sm:$0xf0]  ;;  %v1343_v31 = vor.u32 %v1860_v18, %v1342_v17  ;;  %1032 = vmatpush.bf16.msra.mxu2 %v1615_v20  ;;  %v1910_v57 = vld [vmem:[%s2340_s5 + $0x1a4] sm:$0xf]  ;;  %v1427_v0 = vor.u32 %v1878_v55, %v1424_v56 }
  0x47   : > { %v1598_v23 = vld [vmem:[%s2340_s5 + $0x200] sm:$0xf]  ;;  %v1924_v25 = vld [vmem:[%s2340_s5 + $0x20c] sm:$0xf0]  ;;  %v1471_v35 = vor.u32 %v1892_v22, %v1470_v21  ;;  %1045 = vmatpush.bf16.msra.mxu3 %v1743_v24  ;;  %v1552_v59 = vld [vmem:[%s2340_s5 + $0x1b0] sm:$0xf0] }
  0x48   : > { %v1726_v26 = vld [vmem:[%s2340_s5 + $0x300] sm:$0xf]  ;;  %v1956_v27 = vld [vmem:[%s2340_s5 + $0x30c] sm:$0xf0]  ;;  %v1599_v36 = vor.u32 %v1924_v25, %v1598_v23  ;;  %1007 = vmatpush.bf16.msra.mxu0 %v1343_v31  ;;  %v1942_v60 = vld [vmem:[%s2340_s5 + $0x2a4] sm:$0xf]  ;;  %v1555_v2 = vor.u32 %v1910_v57, %v1552_v59 }
  0x49   : > { %v1727_v39 = vor.u32 %v1956_v27, %v1726_v26  ;;  %1020 = vmatpush.bf16.msra.mxu1 %v1471_v35  ;;  %v1680_v61 = vld [vmem:[%s2340_s5 + $0x2b0] sm:$0xf0]  ;;  %v1974_v62 = vld [vmem:[%s2340_s5 + $0x3a4] sm:$0xf]  ;;  %v213_v1 = vld [vmem:[#allocation2 + $0x8] sm:$0xff] }
  0x4a   : > { %1033 = vmatpush.bf16.msra.mxu2 %v1599_v36  ;;  %v1808_v63 = vld [vmem:[%s2340_s5 + $0x3b0] sm:$0xf0]  ;;  %v1683_v3 = vor.u32 %v1942_v60, %v1680_v61  ;;  %v1874_v4 = vld [vmem:[%s2340_s5 + $0x84] sm:$0xf]  ;;  %v350_v7 = vunpack.c.l.b16 %v213_v1  ;;  %v351_v8 = vunpack.c.h.b16 %v213_v1 }
  0x4b   : > { %1046 = vmatpush.bf16.msra.mxu3 %v1727_v39  ;;  %v1408_v5 = vld [vmem:[%s2340_s5 + $0x90] sm:$0xf0]  ;;  %v1906_v6 = vld [vmem:[%s2340_s5 + $0x184] sm:$0xf]  ;;  %v1811_v9 = vor.u32 %v1974_v62, %v1808_v63 }
  0x4c   : > { %1052 = vmatpush.bf16.msrb.mxu0 %v1459_v40  ;;  %v1536_v10 = vld [vmem:[%s2340_s5 + $0x190] sm:$0xf0]  ;;  %v1938_v11 = vld [vmem:[%s2340_s5 + $0x284] sm:$0xf]  ;;  %v2442_v15 = vpack.c.b16 %v350_v7, %v350_v7  ;;  %v2444_v16 = vpack.c.b16 %v351_v8, %v351_v8  ;;  %v1411_v18 = vor.u32 %v1874_v4, %v1408_v5  ;;  %v1889_v7 = vld [vmem:[%s2340_s5 + $0xf4] sm:$0xf0] }
  0x4d   : > { %1065 = vmatpush.bf16.msrb.mxu1 %v1587_v41  ;;  %v1664_v12 = vld [vmem:[%s2340_s5 + $0x290] sm:$0xf0]  ;;  %v1970_v13 = vld [vmem:[%s2340_s5 + $0x384] sm:$0xf]  ;;  %v1539_v21 = vor.u32 %v1906_v6, %v1536_v10  ;;  %v1462_v6 = vld [vmem:[%s2340_s5 + $0xe8] sm:$0xf] }
  0x4e   : > { %1078 = vmatpush.bf16.msrb.mxu2 %v1715_v42  ;;  %v1792_v14 = vld [vmem:[%s2340_s5 + $0x390] sm:$0xf0]  ;;  %v1667_v22 = vor.u32 %v1938_v11, %v1664_v12  ;;  %v1870_v23 = vld [vmem:[%s2340_s5 + $0x64] sm:$0xf]  ;;  %1047 = vmatmul.bf16.vlgmr.msra.gmra.mxu3 %v2444_v16  ;;  %v1590_v8 = vld [vmem:[%s2340_s5 + $0x1e8] sm:$0xf] }
  0x4f   : > { %1091 = vmatpush.bf16.msrb.mxu3 %v1843_v46  ;;  %v212_v17 = vld [vmem:[#allocation2] sm:$0xff]  ;;  %v1902_v25 = vld [vmem:[%s2340_s5 + $0x164] sm:$0xf]  ;;  %v1795_v26 = vor.u32 %v1970_v13, %v1792_v14  ;;  %1034 = vmatmul.bf16.vlgmr.msra.gmra.mxu2 %v2442_v15  ;;  %v1921_v10 = vld [vmem:[%s2340_s5 + $0x1f4] sm:$0xf0] }
  0x50   : > { %1053 = vmatpush.bf16.msrb.mxu0 %v1443_v52  ;;  %v348_v19 = vunpack.c.l.b16 %v212_v17  ;;  %v349_v20 = vunpack.c.h.b16 %v212_v17  ;;  %v1392_v24 = vld [vmem:[%s2340_s5 + $0x70] sm:$0xf0]  ;;  %v1934_v28 = vld [vmem:[%s2340_s5 + $0x264] sm:$0xf]  ;;  %v1718_v11 = vld [vmem:[%s2340_s5 + $0x2e8] sm:$0xf] }
  0x51   : > { %1066 = vmatpush.bf16.msrb.mxu1 %v1571_v53  ;;  %v1520_v27 = vld [vmem:[%s2340_s5 + $0x170] sm:$0xf0]  ;;  %v1966_v32 = vld [vmem:[%s2340_s5 + $0x364] sm:$0xf]  ;;  %v1395_v34 = vor.u32 %v1870_v23, %v1392_v24  ;;  %v1953_v12 = vld [vmem:[%s2340_s5 + $0x2f4] sm:$0xf0] }
  0x52   : > { %1079 = vmatpush.bf16.msrb.mxu2 %v1699_v54  ;;  %v1648_v29 = vld [vmem:[%s2340_s5 + $0x270] sm:$0xf0]  ;;  %v2453_v30 = vpack.c.b16 %v348_v19, %v348_v19  ;;  %v2455_v31 = vpack.c.b16 %v349_v20, %v349_v20  ;;  %v1523_v35 = vor.u32 %v1902_v25, %v1520_v27  ;;  %v1866_v37 = vld [vmem:[%s2340_s5 + $0x44] sm:$0xf]  ;;  %v1846_v17 = vld [vmem:[%s2340_s5 + $0x3e8] sm:$0xf]  ;;  %v1463_v20 = vor.u32 %v1889_v7, %v1462_v6 }
  0x53   : > { %1092 = vmatpush.bf16.msrb.mxu3 %v1827_v58  ;;  %v1776_v33 = vld [vmem:[%s2340_s5 + $0x370] sm:$0xf0]  ;;  %v1651_v36 = vor.u32 %v1934_v28, %v1648_v29  ;;  %v1898_v39 = vld [vmem:[%s2340_s5 + $0x144] sm:$0xf]  ;;  %v1446_v23 = vld [vmem:[%s2340_s5 + $0xc8] sm:$0xf] }
  0x54   : > { %1054 = vmatpush.bf16.msrb.mxu0 %v1427_v0  ;;  %1021 = vmatmul.bf16.vlgmr.msra.gmra.mxu1 %v2455_v31  ;;  %v1376_v38 = vld [vmem:[%s2340_s5 + $0x50] sm:$0xf0]  ;;  %v1779_v40 = vor.u32 %v1966_v32, %v1776_v33  ;;  %v1930_v42 = vld [vmem:[%s2340_s5 + $0x244] sm:$0xf]  ;;  %v1885_v24 = vld [vmem:[%s2340_s5 + $0xd4] sm:$0xf0] }
  0x55   : > { %1067 = vmatpush.bf16.msrb.mxu1 %v1555_v2  ;;  %v1504_v41 = vld [vmem:[%s2340_s5 + $0x150] sm:$0xf0]  ;;  %1008 = vmatmul.bf16.vlgmr.msra.gmra.mxu0 %v2453_v30  ;;  %v1962_v44 = vld [vmem:[%s2340_s5 + $0x344] sm:$0xf]  ;;  %v1379_v46 = vor.u32 %v1866_v37, %v1376_v38  ;;  %v1574_v25 = vld [vmem:[%s2340_s5 + $0x1c8] sm:$0xf] }
  0x56   : > { %1080 = vmatpush.bf16.msrb.mxu2 %v1683_v3  ;;  %v1632_v43 = vld [vmem:[%s2340_s5 + $0x250] sm:$0xf0]  ;;  %v1507_v47 = vor.u32 %v1898_v39, %v1504_v41  ;;  %v1862_v49 = vld [vmem:[%s2340_s5 + $0x24] sm:$0xf]  ;;  %v1917_v27 = vld [vmem:[%s2340_s5 + $0x1d4] sm:$0xf0] }
  0x57   : > { %1093 = vmatpush.bf16.msrb.mxu3 %v1811_v9  ;;  %v1760_v45 = vld [vmem:[%s2340_s5 + $0x350] sm:$0xf0]  ;;  %v1635_v48 = vor.u32 %v1930_v42, %v1632_v43  ;;  %v1894_v51 = vld [vmem:[%s2340_s5 + $0x124] sm:$0xf]  ;;  %v1702_v28 = vld [vmem:[%s2340_s5 + $0x2c8] sm:$0xf] }
  0x58   : > { %1055 = vmatpush.bf16.msrb.mxu0 %v1411_v18  ;;  %v1360_v50 = vld [vmem:[%s2340_s5 + $0x30] sm:$0xf0]  ;;  %v1763_v52 = vor.u32 %v1962_v44, %v1760_v45  ;;  %v1926_v54 = vld [vmem:[%s2340_s5 + $0x224] sm:$0xf]  ;;  %v1985_v18 = vld [vmem:[%s2340_s5 + $0x3f4] sm:$0xf0] }
  0x59   : > { %1068 = vmatpush.bf16.msrb.mxu1 %v1539_v21  ;;  %v1488_v53 = vld [vmem:[%s2340_s5 + $0x130] sm:$0xf0]  ;;  %v1958_v56 = vld [vmem:[%s2340_s5 + $0x324] sm:$0xf]  ;;  %v1363_v58 = vor.u32 %v1862_v49, %v1360_v50  ;;  %v1591_v21 = vor.u32 %v1921_v10, %v1590_v8  ;;  %v1949_v29 = vld [vmem:[%s2340_s5 + $0x2d4] sm:$0xf0] }
  0x5a   : > { %1081 = vmatpush.bf16.msrb.mxu2 %v1667_v22  ;;  %v1616_v55 = vld [vmem:[%s2340_s5 + $0x230] sm:$0xf0]  ;;  %v1858_v59 = vld [vmem:[%s2340_s5 + $0x4] sm:$0xf]  ;;  %v1491_v61 = vor.u32 %v1894_v51, %v1488_v53  ;;  %v1719_v22 = vor.u32 %v1953_v12, %v1718_v11  ;;  %v1830_v32 = vld [vmem:[%s2340_s5 + $0x3c8] sm:$0xf] }
  0x5b   : > { %1094 = vmatpush.bf16.msrb.mxu3 %v1795_v26  ;;  %v1744_v57 = vld [vmem:[%s2340_s5 + $0x330] sm:$0xf0]  ;;  %v1619_v62 = vor.u32 %v1926_v54, %v1616_v55  ;;  %v1890_v63 = vld [vmem:[%s2340_s5 + $0x104] sm:$0xf]  ;;  %v1847_v26 = vor.u32 %v1985_v18, %v1846_v17  ;;  %v1981_v33 = vld [vmem:[%s2340_s5 + $0x3d4] sm:$0xf0] }
  0x5c   : > { %1056 = vmatpush.bf16.msrb.mxu0 %v1395_v34  ;;  %v1344_v60 = vld [vmem:[%s2340_s5 + $0x10] sm:$0xf0]  ;;  %v1922_v1 = vld [vmem:[%s2340_s5 + $0x204] sm:$0xf]  ;;  %v1747_v2 = vor.u32 %v1958_v56, %v1744_v57  ;;  %v1447_v34 = vor.u32 %v1885_v24, %v1446_v23  ;;  %v1430_v37 = vld [vmem:[%s2340_s5 + $0xa8] sm:$0xf] }
  0x5d   : > { %1069 = vmatpush.bf16.msrb.mxu1 %v1523_v35  ;;  %v1472_v0 = vld [vmem:[%s2340_s5 + $0x110] sm:$0xf0]  ;;  %v1954_v4 = vld [vmem:[%s2340_s5 + $0x304] sm:$0xf]  ;;  %v1347_v9 = vor.u32 %v1858_v59, %v1344_v60  ;;  %v1575_v35 = vor.u32 %v1917_v27, %v1574_v25  ;;  %v1881_v38 = vld [vmem:[%s2340_s5 + $0xb4] sm:$0xf0] }
  0x5e   : > { %1082 = vmatpush.bf16.msrb.mxu2 %v1651_v36  ;;  %v1600_v3 = vld [vmem:[%s2340_s5 + $0x210] sm:$0xf0]  ;;  %v1475_v13 = vor.u32 %v1890_v63, %v1472_v0  ;;  %v1703_v36 = vor.u32 %v1949_v29, %v1702_v28  ;;  %v1558_v39 = vld [vmem:[%s2340_s5 + $0x1a8] sm:$0xf]  ;;  %v1913_v41 = vld [vmem:[%s2340_s5 + $0x1b4] sm:$0xf0] }
  0x5f   : > { %1095 = vmatpush.bf16.msrb.mxu3 %v1779_v40  ;;  %v1728_v5 = vld [vmem:[%s2340_s5 + $0x310] sm:$0xf0]  ;;  %v1603_v14 = vor.u32 %v1922_v1, %v1600_v3  ;;  %v1831_v40 = vor.u32 %v1981_v33, %v1830_v32  ;;  %v1686_v42 = vld [vmem:[%s2340_s5 + $0x2a8] sm:$0xf]  ;;  %v1945_v43 = vld [vmem:[%s2340_s5 + $0x2b4] sm:$0xf0] }
  0x60   : > { %1057 = vmatpush.bf16.msrb.mxu0 %v1379_v46  ;;  %v1731_v19 = vor.u32 %v1954_v4, %v1728_v5  ;;  %v1814_v44 = vld [vmem:[%s2340_s5 + $0x3a8] sm:$0xf]  ;;  %v1977_v45 = vld [vmem:[%s2340_s5 + $0x3b4] sm:$0xf0]  ;;  %v1431_v46 = vor.u32 %v1881_v38, %v1430_v37 }
  0x61   : > { %1070 = vmatpush.bf16.msrb.mxu1 %v1507_v47  ;;  %v1559_v47 = vor.u32 %v1913_v41, %v1558_v39  ;;  %v1414_v49 = vld [vmem:[%s2340_s5 + $0x88] sm:$0xf]  ;;  %v1877_v50 = vld [vmem:[%s2340_s5 + $0x94] sm:$0xf0] }
  0x62   : > { %1083 = vmatpush.bf16.msrb.mxu2 %v1635_v48  ;;  %v1687_v48 = vor.u32 %v1945_v43, %v1686_v42  ;;  %v1542_v51 = vld [vmem:[%s2340_s5 + $0x188] sm:$0xf]  ;;  %v1909_v53 = vld [vmem:[%s2340_s5 + $0x194] sm:$0xf0] }
  0x63   : > { %1096 = vmatpush.bf16.msrb.mxu3 %v1763_v52  ;;  %v1815_v52 = vor.u32 %v1977_v45, %v1814_v44  ;;  %v1670_v54 = vld [vmem:[%s2340_s5 + $0x288] sm:$0xf]  ;;  %v1941_v55 = vld [vmem:[%s2340_s5 + $0x294] sm:$0xf0]  ;;  %v1543_v59 = vor.u32 %v1909_v53, %v1542_v51  ;;  %v1951_v51 = vld [vmem:[%s2340_s5 + $0x2ec] sm:$0xf] }
  0x64   : > { %1058 = vmatpush.bf16.msrb.mxu0 %v1363_v58  ;;  %v1798_v56 = vld [vmem:[%s2340_s5 + $0x388] sm:$0xf]  ;;  %v1973_v57 = vld [vmem:[%s2340_s5 + $0x394] sm:$0xf0]  ;;  %v1415_v58 = vor.u32 %v1877_v50, %v1414_v49  ;;  %v1671_v60 = vor.u32 %v1941_v55, %v1670_v54  ;;  %v1592_v50 = vld [vmem:[%s2340_s5 + $0x1f8] sm:$0xf0] }
  0x65   : > { %1071 = vmatpush.bf16.msrb.mxu1 %v1491_v61  ;;  %v1398_v61 = vld [vmem:[%s2340_s5 + $0x68] sm:$0xf]  ;;  %v1799_v0 = vor.u32 %v1973_v57, %v1798_v56  ;;  %v1905_v1 = vld [vmem:[%s2340_s5 + $0x174] sm:$0xf0]  ;;  %v1983_v55 = vld [vmem:[%s2340_s5 + $0x3ec] sm:$0xf] }
  0x66   : > { %1084 = vmatpush.bf16.msrb.mxu2 %v1619_v62  ;;  %v1873_v62 = vld [vmem:[%s2340_s5 + $0x74] sm:$0xf0]  ;;  %v1526_v63 = vld [vmem:[%s2340_s5 + $0x168] sm:$0xf]  ;;  %v1848_v56 = vld [vmem:[%s2340_s5 + $0x3f8] sm:$0xf0] }
  0x67   : > { %1097 = vmatpush.bf16.msrb.mxu3 %v1747_v2  ;;  %v1654_v2 = vld [vmem:[%s2340_s5 + $0x268] sm:$0xf]  ;;  %v1937_v3 = vld [vmem:[%s2340_s5 + $0x274] sm:$0xf0]  ;;  %v1399_v6 = vor.u32 %v1873_v62, %v1398_v61  ;;  %v1527_v7 = vor.u32 %v1905_v1, %v1526_v63  ;;  %v1883_v61 = vld [vmem:[%s2340_s5 + $0xcc] sm:$0xf] }
  0x68   : > { %1059 = vmatpush.bf16.msrb.mxu0 %v1347_v9  ;;  %v1782_v4 = vld [vmem:[%s2340_s5 + $0x368] sm:$0xf]  ;;  %v1969_v5 = vld [vmem:[%s2340_s5 + $0x374] sm:$0xf0]  ;;  %v1655_v8 = vor.u32 %v1937_v3, %v1654_v2  ;;  %v1448_v62 = vld [vmem:[%s2340_s5 + $0xd8] sm:$0xf0] }
  0x69   : > { %1072 = vmatpush.bf16.msrb.mxu1 %v1475_v13  ;;  %v1382_v9 = vld [vmem:[%s2340_s5 + $0x48] sm:$0xf]  ;;  %v1869_v10 = vld [vmem:[%s2340_s5 + $0x54] sm:$0xf0]  ;;  %v1783_v12 = vor.u32 %v1969_v5, %v1782_v4  ;;  %v1915_v63 = vld [vmem:[%s2340_s5 + $0x1cc] sm:$0xf] }
  0x6a   : > { %1085 = vmatpush.bf16.msrb.mxu2 %v1603_v14  ;;  %v1510_v11 = vld [vmem:[%s2340_s5 + $0x148] sm:$0xf]  ;;  %v1901_v13 = vld [vmem:[%s2340_s5 + $0x154] sm:$0xf0]  ;;  %v1576_v1 = vld [vmem:[%s2340_s5 + $0x1d8] sm:$0xf0] }
  0x6b   : > { %1098 = vmatpush.bf16.msrb.mxu3 %v1731_v19  ;;  %1060 = vmatmul.bf16.vlgmr.msrb.gmra.mxu0 %v2453_v30  ;;  %v1638_v14 = vld [vmem:[%s2340_s5 + $0x248] sm:$0xf]  ;;  %v1933_v17 = vld [vmem:[%s2340_s5 + $0x254] sm:$0xf0]  ;;  %v1947_v2 = vld [vmem:[%s2340_s5 + $0x2cc] sm:$0xf] }
  0x6c   : > { %1104 = vmatpush.bf16.msra.mxu0 %v1463_v20  ;;  %1073 = vmatmul.bf16.vlgmr.msrb.gmra.mxu1 %v2455_v31  ;;  %v1766_v18 = vld [vmem:[%s2340_s5 + $0x348] sm:$0xf]  ;;  %v1965_v19 = vld [vmem:[%s2340_s5 + $0x354] sm:$0xf0]  ;;  %v1383_v20 = vor.u32 %v1869_v10, %v1382_v9  ;;  %v1704_v3 = vld [vmem:[%s2340_s5 + $0x2d8] sm:$0xf0] }
  0x6d   : > { %1117 = vmatpush.bf16.msra.mxu1 %v1591_v21  ;;  %1086 = vmatmul.bf16.vlgmr.msrb.gmra.mxu2 %v2442_v15  ;;  %v1511_v21 = vor.u32 %v1901_v13, %v1510_v11  ;;  %v1366_v23 = vld [vmem:[%s2340_s5 + $0x28] sm:$0xf]  ;;  %v1865_v24 = vld [vmem:[%s2340_s5 + $0x34] sm:$0xf0]  ;;  %v1979_v4 = vld [vmem:[%s2340_s5 + $0x3cc] sm:$0xf] }
  0x6e   : > { %1130 = vmatpush.bf16.msra.mxu2 %v1719_v22  ;;  %1099 = vmatmul.bf16.vlgmr.msrb.gmra.mxu3 %v2444_v16  ;;  %v1639_v22 = vor.u32 %v1933_v17, %v1638_v14  ;;  %v1494_v25 = vld [vmem:[%s2340_s5 + $0x128] sm:$0xf]  ;;  %v1897_v27 = vld [vmem:[%s2340_s5 + $0x134] sm:$0xf0]  ;;  %v1832_v5 = vld [vmem:[%s2340_s5 + $0x3d8] sm:$0xf0] }
  0x6f   : > { %1143 = vmatpush.bf16.msra.mxu3 %v1847_v26  ;;  %v1767_v26 = vor.u32 %v1965_v19, %v1766_v18  ;;  %v1622_v28 = vld [vmem:[%s2340_s5 + $0x228] sm:$0xf]  ;;  %v1929_v29 = vld [vmem:[%s2340_s5 + $0x234] sm:$0xf0]  ;;  %v1495_v37 = vor.u32 %v1897_v27, %v1494_v25  ;;  %v1879_v9 = vld [vmem:[%s2340_s5 + $0xac] sm:$0xf] }
  0x70   : > { %1105 = vmatpush.bf16.msra.mxu0 %v1447_v34  ;;  %v1750_v32 = vld [vmem:[%s2340_s5 + $0x328] sm:$0xf]  ;;  %v1961_v33 = vld [vmem:[%s2340_s5 + $0x334] sm:$0xf0]  ;;  %v1367_v34 = vor.u32 %v1865_v24, %v1366_v23  ;;  %v1623_v38 = vor.u32 %v1929_v29, %v1622_v28  ;;  %v1432_v10 = vld [vmem:[%s2340_s5 + $0xb8] sm:$0xf0] }
  0x71   : > { %1118 = vmatpush.bf16.msra.mxu1 %v1575_v35  ;;  %v1350_v35 = vld [vmem:[%s2340_s5 + $0x8] sm:$0xf]  ;;  %v1751_v42 = vor.u32 %v1961_v33, %v1750_v32  ;;  %v1925_v43 = vld [vmem:[%s2340_s5 + $0x214] sm:$0xf0]  ;;  %v1911_v11 = vld [vmem:[%s2340_s5 + $0x1ac] sm:$0xf] }
  0x72   : > { %1131 = vmatpush.bf16.msra.mxu2 %v1703_v36  ;;  %v1861_v36 = vld [vmem:[%s2340_s5 + $0x14] sm:$0xf0]  ;;  %v1478_v39 = vld [vmem:[%s2340_s5 + $0x108] sm:$0xf]  ;;  %v1560_v13 = vld [vmem:[%s2340_s5 + $0x1b8] sm:$0xf0] }
  0x73   : > { %1144 = vmatpush.bf16.msra.mxu3 %v1831_v40  ;;  %v1893_v40 = vld [vmem:[%s2340_s5 + $0x114] sm:$0xf0]  ;;  %v1606_v41 = vld [vmem:[%s2340_s5 + $0x208] sm:$0xf]  ;;  %v1351_v49 = vor.u32 %v1861_v36, %v1350_v35  ;;  %v1943_v14 = vld [vmem:[%s2340_s5 + $0x2ac] sm:$0xf] }
  0x74   : > { %1106 = vmatpush.bf16.msra.mxu0 %v1431_v46  ;;  %v1734_v44 = vld [vmem:[%s2340_s5 + $0x308] sm:$0xf]  ;;  %v1957_v45 = vld [vmem:[%s2340_s5 + $0x314] sm:$0xf0]  ;;  %v1887_v46 = vld [vmem:[%s2340_s5 + $0xec] sm:$0xf]  ;;  %v1479_v53 = vor.u32 %v1893_v40, %v1478_v39  ;;  %v1607_v54 = vor.u32 %v1925_v43, %v1606_v41 }
  0x75   : > { %1119 = vmatpush.bf16.msra.mxu1 %v1559_v47  ;;  %v1464_v47 = vld [vmem:[%s2340_s5 + $0xf8] sm:$0xf0]  ;;  %v1735_v57 = vor.u32 %v1957_v45, %v1734_v44  ;;  %v1975_v18 = vld [vmem:[%s2340_s5 + $0x3ac] sm:$0xf] }
  0x76   : > { %1132 = vmatpush.bf16.msra.mxu2 %v1687_v48  ;;  %v1919_v48 = vld [vmem:[%s2340_s5 + $0x1ec] sm:$0xf]  ;;  %v1688_v17 = vld [vmem:[%s2340_s5 + $0x2b8] sm:$0xf0] }
  0x77   : > { %1145 = vmatpush.bf16.msra.mxu3 %v1815_v52  ;;  %v1720_v52 = vld [vmem:[%s2340_s5 + $0x2f8] sm:$0xf0]  ;;  %v1875_v23 = vld [vmem:[%s2340_s5 + $0x8c] sm:$0xf] }
  0x78   : > { %1107 = vmatpush.bf16.msra.mxu0 %v1415_v58  ;;  %v1467_v58 = vor.u32 %v1887_v46, %v1464_v47  ;;  %v1816_v19 = vld [vmem:[%s2340_s5 + $0x3b8] sm:$0xf0]  ;;  %v1907_v25 = vld [vmem:[%s2340_s5 + $0x18c] sm:$0xf] }
  0x79   : > { %1120 = vmatpush.bf16.msra.mxu1 %v1543_v59  ;;  %v1595_v59 = vor.u32 %v1919_v48, %v1592_v50  ;;  %v1416_v24 = vld [vmem:[%s2340_s5 + $0x98] sm:$0xf0]  ;;  %v1939_v28 = vld [vmem:[%s2340_s5 + $0x28c] sm:$0xf] }
  0x7a   : > { %1133 = vmatpush.bf16.msra.mxu2 %v1671_v60  ;;  %v1723_v60 = vor.u32 %v1951_v51, %v1720_v52  ;;  %v1544_v27 = vld [vmem:[%s2340_s5 + $0x198] sm:$0xf0]  ;;  %v1971_v32 = vld [vmem:[%s2340_s5 + $0x38c] sm:$0xf] }
  0x7b   : > { %1146 = vmatpush.bf16.msra.mxu3 %v1799_v0  ;;  %v1851_v0 = vor.u32 %v1983_v55, %v1848_v56  ;;  %v1672_v29 = vld [vmem:[%s2340_s5 + $0x298] sm:$0xf0]  ;;  %v1547_v35 = vor.u32 %v1907_v25, %v1544_v27  ;;  %v1903_v39 = vld [vmem:[%s2340_s5 + $0x16c] sm:$0xf] }
  0x7c   : > { %1108 = vmatpush.bf16.msra.mxu0 %v1399_v6  ;;  %v1451_v6 = vor.u32 %v1883_v61, %v1448_v62  ;;  %v1800_v33 = vld [vmem:[%s2340_s5 + $0x398] sm:$0xf0]  ;;  %v1675_v36 = vor.u32 %v1939_v28, %v1672_v29  ;;  %v1967_v44 = vld [vmem:[%s2340_s5 + $0x36c] sm:$0xf] }
  0x7d   : > { %1121 = vmatpush.bf16.msra.mxu1 %v1527_v7  ;;  %v1579_v7 = vor.u32 %v1915_v63, %v1576_v1  ;;  %v1803_v40 = vor.u32 %v1971_v32, %v1800_v33  ;;  %v1528_v41 = vld [vmem:[%s2340_s5 + $0x178] sm:$0xf0]  ;;  %v1899_v51 = vld [vmem:[%s2340_s5 + $0x14c] sm:$0xf] }
  0x7e   : > { %1134 = vmatpush.bf16.msra.mxu2 %v1655_v8  ;;  %v1707_v8 = vor.u32 %v1947_v2, %v1704_v3  ;;  %v1656_v43 = vld [vmem:[%s2340_s5 + $0x278] sm:$0xf0]  ;;  %v1531_v47 = vor.u32 %v1903_v39, %v1528_v41  ;;  %v1963_v56 = vld [vmem:[%s2340_s5 + $0x34c] sm:$0xf] }
  0x7f   : > { %1147 = vmatpush.bf16.msra.mxu3 %v1783_v12  ;;  %v1835_v12 = vor.u32 %v1979_v4, %v1832_v5  ;;  %v1784_v45 = vld [vmem:[%s2340_s5 + $0x378] sm:$0xf0]  ;;  %v1863_v61 = vld [vmem:[%s2340_s5 + $0x2c] sm:$0xf] }
  0x80   : > { %1109 = vmatpush.bf16.msra.mxu0 %v1383_v20  ;;  %v1435_v20 = vor.u32 %v1879_v9, %v1432_v10  ;;  %v1384_v50 = vld [vmem:[%s2340_s5 + $0x58] sm:$0xf0]  ;;  %v1787_v52 = vor.u32 %v1967_v44, %v1784_v45  ;;  %v1895_v63 = vld [vmem:[%s2340_s5 + $0x12c] sm:$0xf] }
  0x81   : > { %1122 = vmatpush.bf16.msra.mxu1 %v1511_v21  ;;  %v1563_v21 = vor.u32 %v1911_v11, %v1560_v13  ;;  %v1640_v55 = vld [vmem:[%s2340_s5 + $0x258] sm:$0xf0]  ;;  %v1927_v2 = vld [vmem:[%s2340_s5 + $0x22c] sm:$0xf] }
  0x82   : > { %1135 = vmatpush.bf16.msra.mxu2 %v1639_v22  ;;  %v1691_v22 = vor.u32 %v1943_v14, %v1688_v17  ;;  %v1368_v62 = vld [vmem:[%s2340_s5 + $0x38] sm:$0xf0]  ;;  %v1959_v4 = vld [vmem:[%s2340_s5 + $0x32c] sm:$0xf] }
  0x83   : > { %1148 = vmatpush.bf16.msra.mxu3 %v1767_v26  ;;  %v1819_v26 = vor.u32 %v1975_v18, %v1816_v19  ;;  %v1496_v1 = vld [vmem:[%s2340_s5 + $0x138] sm:$0xf0]  ;;  %v1859_v9 = vld [vmem:[%s2340_s5 + $0xc] sm:$0xf] }
  0x84   : > { %1110 = vmatpush.bf16.msra.mxu0 %v1367_v34  ;;  %v1419_v34 = vor.u32 %v1875_v23, %v1416_v24  ;;  %v1624_v3 = vld [vmem:[%s2340_s5 + $0x238] sm:$0xf0]  ;;  %v1891_v11 = vld [vmem:[%s2340_s5 + $0x10c] sm:$0xf] }
  0x85   : > { %1123 = vmatpush.bf16.msra.mxu1 %v1495_v37  ;;  %v1871_v37 = vld [vmem:[%s2340_s5 + $0x6c] sm:$0xf]  ;;  %v1752_v5 = vld [vmem:[%s2340_s5 + $0x338] sm:$0xf0] }
  0x86   : > { %1136 = vmatpush.bf16.msra.mxu2 %v1623_v38  ;;  %v1400_v38 = vld [vmem:[%s2340_s5 + $0x78] sm:$0xf0]  ;;  %v1923_v14 = vld [vmem:[%s2340_s5 + $0x20c] sm:$0xf] }
  0x87   : > { %1149 = vmatpush.bf16.msra.mxu3 %v1751_v42  ;;  %v1935_v42 = vld [vmem:[%s2340_s5 + $0x26c] sm:$0xf]  ;;  %v1403_v46 = vor.u32 %v1871_v37, %v1400_v38  ;;  %v1352_v10 = vld [vmem:[%s2340_s5 + $0x18] sm:$0xf0] }
  0x88   : > { %1111 = vmatpush.bf16.msra.mxu0 %v1351_v49  ;;  %v1659_v48 = vor.u32 %v1935_v42, %v1656_v43  ;;  %v1867_v49 = vld [vmem:[%s2340_s5 + $0x4c] sm:$0xf]  ;;  %v1480_v13 = vld [vmem:[%s2340_s5 + $0x118] sm:$0xf0] }
  0x89   : > { %1124 = vmatpush.bf16.msra.mxu1 %v1479_v53  ;;  %v1512_v53 = vld [vmem:[%s2340_s5 + $0x158] sm:$0xf0]  ;;  %v1955_v18 = vld [vmem:[%s2340_s5 + $0x30c] sm:$0xf] }
  0x8a   : > { %1137 = vmatpush.bf16.msra.mxu2 %v1607_v54  ;;  %v1931_v54 = vld [vmem:[%s2340_s5 + $0x24c] sm:$0xf]  ;;  %v1608_v17 = vld [vmem:[%s2340_s5 + $0x218] sm:$0xf0] }
  0x8b   : > { %1150 = vmatpush.bf16.msra.mxu3 %v1735_v57  ;;  %1112 = vmatmul.bf16.vlgmr.msra.gmra.mxu0 %v2453_v30  ;;  %v1768_v57 = vld [vmem:[%s2340_s5 + $0x358] sm:$0xf0] }
  0x8c   : > { %1156 = vmatpush.bf16.msrb.mxu0 %v1467_v58  ;;  %1125 = vmatmul.bf16.vlgmr.msra.gmra.mxu1 %v2455_v31  ;;  %v1387_v58 = vor.u32 %v1867_v49, %v1384_v50  ;;  %v1736_v19 = vld [vmem:[%s2340_s5 + $0x318] sm:$0xf0] }
  0x8d   : > { %1169 = vmatpush.bf16.msrb.mxu1 %v1595_v59  ;;  %1138 = vmatmul.bf16.vlgmr.msra.gmra.mxu2 %v2442_v15  ;;  %v1515_v59 = vor.u32 %v1899_v51, %v1512_v53  ;;  %v1739_v23 = vor.u32 %v1955_v18, %v1736_v19 }
  0x8e   : > { %1182 = vmatpush.bf16.msrb.mxu2 %v1723_v60  ;;  %1151 = vmatmul.bf16.vlgmr.msra.gmra.mxu3 %v2444_v16  ;;  %v1643_v60 = vor.u32 %v1931_v54, %v1640_v55 }
  0x8f   : > { %1195 = vmatpush.bf16.msrb.mxu3 %v1851_v0  ;;  %v1771_v0 = vor.u32 %v1963_v56, %v1768_v57 }
  0x90   : > { %1157 = vmatpush.bf16.msrb.mxu0 %v1451_v6  ;;  %v1371_v6 = vor.u32 %v1863_v61, %v1368_v62 }
  0x91   : > { %1170 = vmatpush.bf16.msrb.mxu1 %v1579_v7  ;;  %v1499_v7 = vor.u32 %v1895_v63, %v1496_v1 }
  0x92   : > { %1183 = vmatpush.bf16.msrb.mxu2 %v1707_v8  ;;  %v1627_v8 = vor.u32 %v1927_v2, %v1624_v3 }
  0x93   : > { %1196 = vmatpush.bf16.msrb.mxu3 %v1835_v12  ;;  %v1755_v12 = vor.u32 %v1959_v4, %v1752_v5 }
  0x94   : > { %1158 = vmatpush.bf16.msrb.mxu0 %v1435_v20  ;;  %v1355_v20 = vor.u32 %v1859_v9, %v1352_v10 }
  0x95   : > { %1171 = vmatpush.bf16.msrb.mxu1 %v1563_v21  ;;  %v1483_v21 = vor.u32 %v1891_v11, %v1480_v13 }
  0x96   : > { %1184 = vmatpush.bf16.msrb.mxu2 %v1691_v22  ;;  %v1611_v22 = vor.u32 %v1923_v14, %v1608_v17 }
  0x97   : > { %1197 = vmatpush.bf16.msrb.mxu3 %v1819_v26 }
  0x98   : > { %1159 = vmatpush.bf16.msrb.mxu0 %v1419_v34 }
  0x99   : > { %1172 = vmatpush.bf16.msrb.mxu1 %v1547_v35 }
  0x9a   : > { %1185 = vmatpush.bf16.msrb.mxu2 %v1675_v36 }
  0x9b   : > { %1198 = vmatpush.bf16.msrb.mxu3 %v1803_v40 }
  0x9c   : > { %1160 = vmatpush.bf16.msrb.mxu0 %v1403_v46 }
  0x9d   : > { %1173 = vmatpush.bf16.msrb.mxu1 %v1531_v47 }
  0x9e   : > { %1186 = vmatpush.bf16.msrb.mxu2 %v1659_v48 }
  0x9f   : > { %1199 = vmatpush.bf16.msrb.mxu3 %v1787_v52 }
  0xa0   : > { %1161 = vmatpush.bf16.msrb.mxu0 %v1387_v58 }
  0xa1   : > { %1174 = vmatpush.bf16.msrb.mxu1 %v1515_v59 }
  0xa2   : > { %1187 = vmatpush.bf16.msrb.mxu2 %v1643_v60 }
  0xa3   : > { %1200 = vmatpush.bf16.msrb.mxu3 %v1771_v0 }
  0xa4   : > { %1162 = vmatpush.bf16.msrb.mxu0 %v1371_v6 }
  0xa5   : > { %1175 = vmatpush.bf16.msrb.mxu1 %v1499_v7 }
  0xa6   : > { %1188 = vmatpush.bf16.msrb.mxu2 %v1627_v8 }
  0xa7   : > { %1201 = vmatpush.bf16.msrb.mxu3 %v1755_v12 }
  0xa8   : > { %1163 = vmatpush.bf16.msrb.mxu0 %v1355_v20 }
  0xa9   : > { %1176 = vmatpush.bf16.msrb.mxu1 %v1483_v21 }
  0xaa   : > { %1189 = vmatpush.bf16.msrb.mxu2 %v1611_v22 }
  0xab   : > { %1202 = vmatpush.bf16.msrb.mxu3 %v1739_v23  ;;  %1164 = vmatmul.bf16.vlgmr.msrb.gmra.mxu0 %v2453_v30 }
  0xac   : > { %1177 = vmatmul.bf16.vlgmr.msrb.gmra.mxu1 %v2455_v31 }
  0xad   : > { %1190 = vmatmul.bf16.vlgmr.msrb.gmra.mxu2 %v2442_v15 }
  0xae   : > { %1203 = vmatmul.bf16.vlgmr.msrb.gmra.mxu3 %v2444_v16 }
  0xd1   : > { %v1022_v24 = vpop.f32.mrf.mxu1  ;;  %v1048_v29 = vpop.f32.mrf.mxu3 }
  0xd2   : > { %v1009_v25 = vpop.f32.mrf.mxu0  ;;  %v1035_v27 = vpop.f32.mrf.mxu2 }
  0xd3   : > { %v1023_v26 = vadd.f32 %v1022_v24, %v1009_v25 }
  0xd5   : > { %v1036_v28 = vadd.f32 %v1035_v27, %v1023_v26 }
  0xd7   : > { %v1049_v32 = vadd.f32 %v1048_v29, %v1036_v28 }
  0xd9   : > { %v1024_v33 = vpop.f32.mrf.mxu1  ;;  %1212 = vst [vmem:[%s2627_s18] sm:$0xff] %v1049_v32  ;;  %v1050_v31 = vpop.f32.mrf.mxu3 }
  0xda   : > { %v1011_v34 = vpop.f32.mrf.mxu0  ;;  %v1037_v30 = vpop.f32.mrf.mxu2 }
  0xe8   : > { %v1061_v15 = vpop.f32.mrf.mxu0 }
  0xe9   : > { %v1074_v35 = vpop.f32.mrf.mxu1 }
  0xea   : > { %v1075_v16 = vadd.f32 %v1074_v35, %v1061_v15 }
  0xf0   : > { %v1087_v36 = vpop.f32.mrf.mxu2  ;;  %v1063_v40 = vpop.f32.mrf.mxu0 }
  0xf1   : > { %v1088_v37 = vadd.f32 %v1087_v36, %v1075_v16  ;;  %v1100_v38 = vpop.f32.mrf.mxu3  ;;  %v1076_v41 = vpop.f32.mrf.mxu1 }
  0xf3   : > { %v1101_v39 = vadd.f32 %v1100_v38, %v1088_v37 }
  0xf5   : > { %1213 = vst [vmem:[%s2627_s18 + $0x8] sm:$0xff] %v1101_v39 }
  0xf8   : > { %v1089_v42 = vpop.f32.mrf.mxu2 }
  0xf9   : > { %v1102_v43 = vpop.f32.mrf.mxu3 }
 0x108   : > { %v1113_v44 = vpop.f32.mrf.mxu0 }
 0x109   : > { %v1126_v45 = vpop.f32.mrf.mxu1 }
 0x10a   : > { %v1127_v46 = vadd.f32 %v1126_v45, %v1113_v44 }
 0x110   : > { %v1139_v47 = vpop.f32.mrf.mxu2  ;;  %v1115_v51 = vpop.f32.mrf.mxu0 }
 0x111   : > { %v1140_v48 = vadd.f32 %v1139_v47, %v1127_v46  ;;  %v1152_v49 = vpop.f32.mrf.mxu3  ;;  %v1128_v52 = vpop.f32.mrf.mxu1 }
 0x113   : > { %v1153_v50 = vadd.f32 %v1152_v49, %v1140_v48 }
 0x115   : > { %1214 = vst [vmem:[%s2627_s18 + $0x10] sm:$0xff] %v1153_v50 }
 0x118   : > { %v1141_v53 = vpop.f32.mrf.mxu2 }
 0x119   : > { %v1154_v54 = vpop.f32.mrf.mxu3 }
 0x128   : > { %v1165_v55 = vpop.f32.mrf.mxu0 }
 0x129   : > { %v1178_v56 = vpop.f32.mrf.mxu1 }
 0x12a   : > { %v1179_v57 = vadd.f32 %v1178_v56, %v1165_v55 }
 0x130   : > { %v1191_v58 = vpop.f32.mrf.mxu2  ;;  %v1167_v61 = vpop.f32.mrf.mxu0 }
 0x131   : > { %v1192_v59 = vadd.f32 %v1191_v58, %v1179_v57  ;;  %v1204_v60 = vpop.f32.mrf.mxu3  ;;  %v1180_v62 = vpop.f32.mrf.mxu1 }
 0x133   : > { %v1205_v63 = vadd.f32 %v1204_v60, %v1192_v59 }
 0x135   : > { %1215 = vst [vmem:[%s2627_s18 + $0x18] sm:$0xff] %v1205_v63 }
 0x138   : > { %v1193_v0 = vpop.f32.mrf.mxu2 }
 0x139   : > { %2151 = shalt.err (!%p2148_p1)
}
 0x13a   : > { %1993 = dma.vmem_to_hbm [thread:$0]  (%p2283_p8), %s1231_s7, 512, %s1233_s8, %s1217_s15   ;;  %v1206_v1 = vpop.f32.mrf.mxu3 }
 0x13b PF: > { %s1244_s17 = sand.u32 1, %s2190_s9   ;;  %p2004_p2 = pnand %p1332_p13, %p2287_p9 }
 0x13c   : > { %s1245_s3 = scalar_lea.sflag [#allocation4], %s1244_s17 }
 0x13d   : > { %p2005_p4 = pneg %p2004_p2 }
 0x13f   : > { %2185 = dma.done.wait (%p2005_p4), %s1245_s3, 512  }
 0x140   : > { %2187 = vsyncadd (%p2005_p4), %s1245_s3, 4294966784  ;;  %s19_s14 = sadd.s32 1, %s2210_s14   ;;  %s2684_s9 = smov %s2194_s10 }
 0x141   : > { %p16_p6 = scmp.ge.s32.totalorder %s19_s14, 4   ;;  %s2685_s10 = smov %s2198_s11 }
 0x142   : > { %s2686_s11 = smov %s2325_s23  ;;  %s2687_s12 = smov %s2206_s13 }
 0x143   : > { %s2688_s13 = smov %s2690_s30  ;;  %18 = sbr.rel (!%p16_p6) target bundleno = 9 (0x9), region = 83 }
 0x148   :  { %1251 = vsyncpa [#allocation3], 1 }
 0x149   :  { %1253 = vsyncpa [#allocation3 + $0x1], 1 }
 0x14a   :  { %1254 = vsyncpa [#allocation6], 1 }
 0x14b   :  { %1256 = vsyncpa [#allocation6 + $0x1], 1 }
 0x14c   :  { %1257 = vsyncpa [#allocation4], 1 }
 0x14d   :  { %1259 = vsyncpa [#allocation4 + $0x1], 1 }

</bundles_post_ra>
